<compile_context>
chip_gen: v7x
topology: tpu7x:2x2x1
jax: 0.10.0
libtpu: 0.0.40
codegen_flags: <defaults>
</compile_context>

<pallas_src>
import zlib
from typing import List, Dict

import jax
import jax.numpy as jnp
from jax import lax
from jax.experimental import pallas as pl
from jax.experimental.pallas import tpu as pltpu


_VMEM = pl.BlockSpec(memory_space=pltpu.MemorySpace.VMEM)
_VMEM_LIMIT = 48 * 1024 * 1024  # raise default scoped VMEM limit (safe on v5e/v6e/v7x)


# ----------------------------------------------------------------------------
# shared LSTM gate math (PyTorch gate order: i, f, g, o); `g` already contains
# x @ W_ih + h @ W_hh + b.
# ----------------------------------------------------------------------------
def _lstm_gates(g, c, H):
    # NOTE: gate slices are not 128-lane aligned at the demo sizes; a no-op at
    # production ELMO_EMBED_DIM where H is a multiple of 128.
    i_g = jax.nn.sigmoid(g[:, 0 * H:1 * H])
    f_g = jax.nn.sigmoid(g[:, 1 * H:2 * H])
    g_g = jnp.tanh(g[:, 2 * H:3 * H])
    o_g = jax.nn.sigmoid(g[:, 3 * H:4 * H])
    c_new = f_g * c + i_g * g_g
    h_new = o_g * jnp.tanh(c_new)
    return h_new, c_new


# ----------------------------------------------------------------------------
# Kernel 1: bidirectional LSTM encoder (fwd + bwd fused into one loop)
# ----------------------------------------------------------------------------
def bilstm_encoder_kernel(x_ref, wihf_ref, whhf_ref, bf_ref,
                          wihb_ref, whhb_ref, bb_ref, h0_ref,
                          outf_ref, outb_ref,
                          xf_sc, xb_sc):
    T, D = x_ref.shape
    H = D  # encoder hidden size == ELMO_EMBED_DIM

    # batched input-to-hidden projections: one (T, D) @ (D, 4D) matmul per direction
    xf_sc[...] = (jnp.dot(x_ref[...], wihf_ref[...], preferred_element_type=jnp.float32)
                  + bf_ref[...])
    xb_sc[...] = (jnp.dot(x_ref[...], wihb_ref[...], preferred_element_type=jnp.float32)
                  + bb_ref[...])

    hf0 = h0_ref[pl.ds(0, 1), :]   # h0 == c0, as in _init_bi_hidden
    hb0 = h0_ref[pl.ds(1, 1), :]

    def step(t, carry):
        hf, cf, hb, cb = carry
        tb = T - 1 - t
        # forward chain
        gf = xf_sc[pl.ds(t, 1), :] + jnp.dot(hf, whhf_ref[...],
                                             preferred_element_type=jnp.float32)
        hf, cf = _lstm_gates(gf, cf, H)
        outf_ref[pl.ds(t, 1), :] = hf
        # backward chain (independent -> interleaved for ILP)
        gb = xb_sc[pl.ds(tb, 1), :] + jnp.dot(hb, whhb_ref[...],
                                              preferred_element_type=jnp.float32)
        hb, cb = _lstm_gates(gb, cb, H)
        outb_ref[pl.ds(tb, 1), :] = hb
        return (hf, cf, hb, cb)

    lax.fori_loop(0, T, step, (hf0, hf0, hb0, hb0))


def run_bilstm_encoder(x, p):
    T, D = x.shape
    return pl.pallas_call(
        bilstm_encoder_kernel,
        out_shape=(jax.ShapeDtypeStruct((T, D), jnp.float32),
                   jax.ShapeDtypeStruct((T, D), jnp.float32)),
        in_specs=[_VMEM] * 8,
        out_specs=(_VMEM, _VMEM),
        scratch_shapes=[pltpu.VMEM((T, 4 * D), jnp.float32),
                        pltpu.VMEM((T, 4 * D), jnp.float32)],
        compiler_params=pltpu.CompilerParams(vmem_limit_bytes=_VMEM_LIMIT),
    )(x, p['enc_wih_f'], p['enc_whh_f'], p['enc_b_f'],
      p['enc_wih_b'], p['enc_whh_b'], p['enc_b_b'], p['enc_h0'])


# ----------------------------------------------------------------------------
# Kernel 2: decoder recurrence + batched attention / VP1 / p_gen
#   Encoder states are consumed as their fwd/bwd halves (weights split in the
#   wrapper), avoiding a JAX-level concat / extra HBM round trip.
# ----------------------------------------------------------------------------
def pg_recurrence_attn_kernel(tgt_ref, encf_ref, encb_ref, h0_ref, c0_ref,
                              dwih_ref, dwhh_ref, db_ref,
                              whf_ref, whb_ref, ws_ref, wsb_ref, vrow_ref,
                              vp1h_ref, vp1cf_ref, vp1cb_ref, vp1b_ref,
                              whpf_ref, whpb_ref, wsp_ref, wxp_ref, wxpb_ref,
                              hid_ref, attn_ref, pgen_ref,
                              hs_sc, xg_sc):
    T_tgt, D = tgt_ref.shape
    T_src = encf_ref.shape[0]
    H = 2 * D

    # hoisted batched input-to-hidden projection for the decoder LSTM
    xg_sc[...] = (jnp.dot(tgt_ref[...], dwih_ref[...], preferred_element_type=jnp.float32)
                  + db_ref[...])

    # ---- Phase 1: serial recurrence (only h @ W_hh inside the loop) ----
    def step(t, carry):
        h, c = carry
        g = xg_sc[pl.ds(t, 1), :] + jnp.dot(h, dwhh_ref[...],
                                            preferred_element_type=jnp.float32)
        h, c = _lstm_gates(g, c, H)
        hs_sc[pl.ds(t, 1), :] = h
        return (h, c)

    lax.fori_loop(0, T_tgt, step, (h0_ref[...], c0_ref[...]))

    hs = hs_sc[...]                                   # (T_tgt, H) — all decoder states
    enc_f = encf_ref[...]                             # (T_src, D)
    enc_b = encb_ref[...]                             # (T_src, D)

    # ---- Phase 2: batched additive attention (enc @ Wh computed exactly once) ----
    enc_wh = (jnp.dot(enc_f, whf_ref[...], preferred_element_type=jnp.float32)
              + jnp.dot(enc_b, whb_ref[...], preferred_element_type=jnp.float32))   # (T_src, H)
    s_ws = jnp.dot(hs, ws_ref[...], preferred_element_type=jnp.float32) + wsb_ref[...]  # (T_tgt, H)

    scores = jnp.tanh(enc_wh[None, :, :] + s_ws[:, None, :])          # (T_tgt, T_src, H)
    e = jnp.sum(scores * vrow_ref[...][None, :, :], axis=-1)          # (T_tgt, T_src)

    # softmax over source positions (lane axis)
    e_max = jnp.max(e, axis=1, keepdims=True)
    ex = jnp.exp(e - e_max)
    attn = ex * pl.reciprocal(jnp.sum(ex, axis=1, keepdims=True), approx=True)
    attn_ref[...] = attn

    # context vectors for all timesteps at once (MXU matmuls)
    ctxt_f = jnp.dot(attn, enc_f, preferred_element_type=jnp.float32)  # (T_tgt, D)
    ctxt_b = jnp.dot(attn, enc_b, preferred_element_type=jnp.float32)  # (T_tgt, D)

    # VP1([h ; ctxt]) for all timesteps (VP1 split into h / ctxt_f / ctxt_b row blocks)
    hid_ref[...] = (jnp.dot(hs, vp1h_ref[...], preferred_element_type=jnp.float32)
                    + jnp.dot(ctxt_f, vp1cf_ref[...], preferred_element_type=jnp.float32)
                    + jnp.dot(ctxt_b, vp1cb_ref[...], preferred_element_type=jnp.float32)
                    + vp1b_ref[...])                                   # (T_tgt, 8D)

    # generation probability for all timesteps
    pgen_ref[...] = jax.nn.sigmoid(
        jnp.dot(ctxt_f, whpf_ref[...], preferred_element_type=jnp.float32)
        + jnp.dot(ctxt_b, whpb_ref[...], preferred_element_type=jnp.float32)
        + jnp.dot(hs, wsp_ref[...], preferred_element_type=jnp.float32)
        + jnp.dot(tgt_ref[...], wxp_ref[...], preferred_element_type=jnp.float32)
        + wxpb_ref[...])                                               # (T_tgt, 1)


def run_pg_recurrence(tgt_x, enc_f, enc_b, h0, p):
    T_tgt, D = tgt_x.shape
    T_src = enc_f.shape[0]
    H = 2 * D
    return pl.pallas_call(
        pg_recurrence_attn_kernel,
        out_shape=(jax.ShapeDtypeStruct((T_tgt, 8 * D), jnp.float32),   # hid (post-VP1)
                   jax.ShapeDtypeStruct((T_tgt, T_src), jnp.float32),   # attention weights
                   jax.ShapeDtypeStruct((T_tgt, 1), jnp.float32)),      # p_gen
        in_specs=[_VMEM] * 22,
        out_specs=(_VMEM, _VMEM, _VMEM),
        scratch_shapes=[pltpu.VMEM((T_tgt, H), jnp.float32),
                        pltpu.VMEM((T_tgt, 4 * H), jnp.float32)],
        compiler_params=pltpu.CompilerParams(vmem_limit_bytes=_VMEM_LIMIT),
    )(tgt_x, enc_f, enc_b, h0, p['dec_c0'],
      p['dec_wih'], p['dec_whh'], p['dec_b'],
      p['Wh'][:D, :], p['Wh'][D:, :], p['Ws'], p['Ws_b'], p['v_row'],
      p['VP1_h'], p['VP1_c'][:D, :], p['VP1_c'][D:, :], p['VP1_b'],
      p['Wh_pgen'][:D, :], p['Wh_pgen'][D:, :], p['Ws_pgen'],
      p['Wx_pgen'], p['Wx_pgen_b'])


# ----------------------------------------------------------------------------
# Kernel 3: vocab projection + pointer mix, tiled over the extended vocab
# ----------------------------------------------------------------------------
def pg_vocab_mix_kernel(hid_ref, attn_ref, pgen_ref,
                        vp2_ref, vp2b_ref, onehot_ref, out_ref):
    # bf16 MXU matmuls with f32 accumulation
    p_vocab = (jnp.dot(hid_ref[...].astype(jnp.bfloat16), vp2_ref[...],
                       preferred_element_type=jnp.float32)
               + vp2b_ref[...])                                        # (T_tgt, TV); cols >= V are 0
    p_attn = jnp.dot(attn_ref[...].astype(jnp.bfloat16), onehot_ref[...],
                     preferred_element_type=jnp.float32)               # (T_tgt, TV)
    pg = pgen_ref[...]                                                 # (T_tgt, 1)
    out_ref[...] = pg * p_vocab + (1.0 - pg) * p_attn


def run_pg_vocab_mix(hid, attn, pgen, vp2_pad, vp2b_pad, onehot, TV):
    T_tgt, H8 = hid.shape
    T_src = attn.shape[1]
    V_pad = vp2_pad.shape[1]
    n_tiles = V_pad // TV
    return pl.pallas_call(
        pg_vocab_mix_kernel,
        out_shape=jax.ShapeDtypeStruct((T_tgt, V_pad), jnp.float32),
        grid_spec=pltpu.PrefetchScalarGridSpec(
            num_scalar_prefetch=0,
            grid=(n_tiles,),
            in_specs=[pl.BlockSpec((T_tgt, H8), lambda j: (0, 0)),     # resident across tiles
                      pl.BlockSpec((T_tgt, T_src), lambda j: (0, 0)),
                      pl.BlockSpec((T_tgt, 1), lambda j: (0, 0)),
                      pl.BlockSpec((H8, TV), lambda j: (0, j)),
                      pl.BlockSpec((1, TV), lambda j: (0, j)),
                      pl.BlockSpec((T_src, TV), lambda j: (0, j))],
            out_specs=pl.BlockSpec((T_tgt, TV), lambda j: (0, j))),
        compiler_params=pltpu.CompilerParams(
            dimension_semantics=("parallel",),
            vmem_limit_bytes=_VMEM_LIMIT),
    )(hid, attn, pgen, vp2_pad, vp2b_pad, onehot)


# ----------------------------------------------------------------------------
# PointerGenerator (train path) — plain-JAX glue around the three kernels
# ----------------------------------------------------------------------------
class PointerGeneratorPallas:
    def __init__(self, vocab: List[str], elmo_embed_dim: int, key):
        self.vocab = sorted(vocab)
        self.vocab_2_ix = {w: i for i, w in enumerate(self.vocab)}
        self.ix_2_vocab = {i: w for w, i in self.vocab_2_ix.items()}
        self.D = elmo_embed_dim
        self.V = len(self.vocab)
        D, H = self.D, 2 * self.D
        ks = iter(jax.random.split(key, 32))

        def rnd(shape, scale=0.1):
            return (scale * jax.random.normal(next(ks), shape)).astype(jnp.float32)

        p = {}
        # encoder BiLSTM (input D, hidden D, gates 4D), weights stored [in, out]
        p['enc_wih_f'] = rnd((D, 4 * D)); p['enc_whh_f'] = rnd((D, 4 * D))
        p['enc_b_f'] = rnd((1, 4 * D))
        p['enc_wih_b'] = rnd((D, 4 * D)); p['enc_whh_b'] = rnd((D, 4 * D))
        p['enc_b_b'] = rnd((1, 4 * D))
        p['enc_h0'] = rnd((2, D), scale=1.0)              # randomize_init_hidden (h0 == c0)
        # decoder LSTM (input D, hidden 2D, gates 8D)
        p['dec_wih'] = rnd((D, 4 * H)); p['dec_whh'] = rnd((H, 4 * H))
        p['dec_b'] = rnd((1, 4 * H))
        p['dec_c0'] = rnd((1, H), scale=1.0)              # torch.randn_like(_init_probe)
        # additive attention
        p['Wh'] = rnd((H, H)); p['Ws'] = rnd((H, H)); p['Ws_b'] = rnd((1, H))
        p['v_row'] = rnd((1, H))                          # v stored as a row vector
        # vocab projection (4D -> 8D -> V); VP1 split into [h | ctxt] halves
        p['VP1_h'] = rnd((H, 8 * D)); p['VP1_c'] = rnd((H, 8 * D)); p['VP1_b'] = rnd((1, 8 * D))
        p['VP2'] = rnd((8 * D, self.V)); p['VP2_b'] = rnd((1, self.V))
        # p_gen gates
        p['Wh_pgen'] = rnd((H, 1)); p['Ws_pgen'] = rnd((H, 1))
        p['Wx_pgen'] = rnd((D, 1)); p['Wx_pgen_b'] = rnd((1, 1))
        self.params = p
        # deterministic stand-in for the ELMo embedder (stable across processes)
        self._embed_key = next(ks)
        self._embed_cache: Dict[str, jnp.ndarray] = {}

    def _embed_token(self, tok: str) -> jnp.ndarray:
        if tok not in self._embed_cache:
            k = jax.random.fold_in(self._embed_key,
                                   zlib.crc32(tok.encode("utf-8")) & 0x7FFFFFFF)
            self._embed_cache[tok] = jax.random.normal(k, (self.D,)).astype(jnp.float32)
        return self._embed_cache[tok]

    def _embed_doc(self, doc_tokens, prepend_START=False):
        flat = [t for sent in doc_tokens for t in sent]
        embs = [self._embed_token(t) for t in flat]
        if prepend_START:
            embs = [self._embed_token('<START>')] + embs[:-1]
        return jnp.stack(embs, axis=0)                    # (T, D)

    def forward(self, orig_text_tokens, summ_text_tokens):
        # ---- encoder ----
        src_x = self._embed_doc(orig_text_tokens)                          # (T_src, D)
        enc_f, enc_b = run_bilstm_encoder(src_x, self.params)              # 2 x (T_src, D)

        # ---- extended vocab bookkeeping (pure python, as in the reference) ----
        flat_src = [t for sent in orig_text_tokens for t in sent]
        new_words = sorted(set(w for w in flat_src if w not in self.vocab_2_ix))
        extended_vocab = self.vocab + new_words
        v2i = {**self.vocab_2_ix,
               **{w: i for w, i in zip(new_words, range(self.V, len(extended_vocab)))}}
        i2v = {i: w for w, i in v2i.items()}
        v_ext = len(extended_vocab)

        # lane-dense padding of the extended vocab + vocab tile size for the gridded kernel
        V_pad = ((v_ext + 127) // 128) * 128
        TV = min(V_pad, 2048)
        V_pad = ((V_pad + TV - 1) // TV) * TV

        # attention -> extended-vocab scatter as a (bf16) one-hot matmul
        src_ids = jnp.array([v2i[w] for w in flat_src], dtype=jnp.int32)
        onehot = jax.nn.one_hot(src_ids, V_pad, dtype=jnp.bfloat16)        # (T_src, V_pad)

        # pad the vocab projection out to V_pad (p_vocab[:, V:] stays 0); bf16 weights
        vp2_pad = jnp.pad(self.params['VP2'],
                          ((0, 0), (0, V_pad - self.V))).astype(jnp.bfloat16)
        vp2b_pad = jnp.pad(self.params['VP2_b'], ((0, 0), (0, V_pad - self.V)))

        # ---- decoder (teacher forcing with <START> prepended) ----
        tgt_x = self._embed_doc(summ_text_tokens, prepend_START=True)      # (T_tgt, D)
        # _init_probe = encoder_states[-1] = [fwd_h(T-1) ; bwd_h(T-1)]
        h0 = jnp.concatenate([enc_f[-1:, :], enc_b[-1:, :]], axis=1)       # (1, 2D)

        hid, attn, pgen = run_pg_recurrence(tgt_x, enc_f, enc_b, h0, self.params)
        p_W_pad = run_pg_vocab_mix(hid, attn, pgen, vp2_pad, vp2b_pad, onehot, TV)
        return p_W_pad[:, :v_ext], v2i, i2v


# ----------------------------------------------------------------------------
if __name__ == "__main__":
    key = jax.random.PRNGKey(0)
    ELMO_DIM = 32
    vocab = [f"w{i:02d}" for i in range(50)]

    model = PointerGeneratorPallas(vocab, ELMO_DIM, key)

    # source: 2 sentences, 8 tokens total, 2 of them OOV
    src_tokens = [["w00", "w03", "oovA", "w07"],
                  ["w10", "oovB", "w21", "w42"]]
    # target summary: 6 tokens (teacher-forced training path)
    tgt_tokens = [["w03", "w07", "oovA", "w10", "w21", "."]]

    p_W, v2i, i2v = model.forward(src_tokens, tgt_tokens)
    p_W = jax.block_until_ready(p_W)

    T_tgt = sum(len(s) for s in tgt_tokens)
    V_ext = len(v2i)
    assert p_W.shape == (T_tgt, V_ext), p_W.shape
    assert bool(jnp.all(jnp.isfinite(p_W)))
    print("KERNEL_OK")
</pallas_src>

<mosaic_0001>
module attributes {stable_mosaic.version = 11 : i64} {
  func.func @bilstm_encoder_kernel(%arg0: memref<8x32xf32, #tpu.memory_space<vmem>>, %arg1: memref<32x128xf32, #tpu.memory_space<vmem>>, %arg2: memref<32x128xf32, #tpu.memory_space<vmem>>, %arg3: memref<1x128xf32, #tpu.memory_space<vmem>>, %arg4: memref<32x128xf32, #tpu.memory_space<vmem>>, %arg5: memref<32x128xf32, #tpu.memory_space<vmem>>, %arg6: memref<1x128xf32, #tpu.memory_space<vmem>>, %arg7: memref<2x32xf32, #tpu.memory_space<vmem>>, %arg8: memref<8x32xf32, #tpu.memory_space<vmem>>, %arg9: memref<8x32xf32, #tpu.memory_space<vmem>>, %arg10: memref<8x128xf32, #tpu.memory_space<vmem>>, %arg11: memref<8x128xf32, #tpu.memory_space<vmem>>) attributes {dimension_semantics = [], scalar_prefetch = 0 : i64, scratch_operands = 2 : i64, tpu.core_type = #tpu.core_type<tc>} {
    %c0 = arith.constant 0 : index
    %c0_0 = arith.constant 0 : index
    %0 = vector.load %arg0[%c0, %c0_0] : memref<8x32xf32, #tpu.memory_space<vmem>>, vector<8x32xf32>
    %c0_1 = arith.constant 0 : index
    %c0_2 = arith.constant 0 : index
    %1 = vector.load %arg1[%c0_1, %c0_2] : memref<32x128xf32, #tpu.memory_space<vmem>>, vector<32x128xf32>
    %cst = arith.constant dense<0.000000e+00> : vector<8x128xf32>
    %2 = tpu.matmul %0, %1, %cst {dimension_numbers = #tpu.dot_dimension_numbers<[1], [0], [0], [1], [0, 0, 1, 1], [], []>} : vector<8x32xf32>, vector<32x128xf32>, vector<8x128xf32> -> vector<8x128xf32>
    %c0_3 = arith.constant 0 : index
    %c0_4 = arith.constant 0 : index
    %3 = vector.load %arg3[%c0_3, %c0_4] : memref<1x128xf32, #tpu.memory_space<vmem>>, vector<1x128xf32>
    %4 = vector.broadcast %3 : vector<1x128xf32> to vector<8x128xf32>
    %5 = arith.addf %2, %4 : vector<8x128xf32>
    %c0_5 = arith.constant 0 : index
    %c0_6 = arith.constant 0 : index
    %6 = vector.load %arg10[%c0_5, %c0_6] : memref<8x128xf32, #tpu.memory_space<vmem>>, vector<8x128xf32>
    tpu.vector_store %arg10[%c0_5, %c0_6], %5 {strides = array<i32>} : memref<8x128xf32, #tpu.memory_space<vmem>>, vector<8x128xf32>,
    %c0_7 = arith.constant 0 : index
    %c0_8 = arith.constant 0 : index
    %7 = vector.load %arg0[%c0_7, %c0_8] : memref<8x32xf32, #tpu.memory_space<vmem>>, vector<8x32xf32>
    %c0_9 = arith.constant 0 : index
    %c0_10 = arith.constant 0 : index
    %8 = vector.load %arg4[%c0_9, %c0_10] : memref<32x128xf32, #tpu.memory_space<vmem>>, vector<32x128xf32>
    %cst_11 = arith.constant dense<0.000000e+00> : vector<8x128xf32>
    %9 = tpu.matmul %7, %8, %cst_11 {dimension_numbers = #tpu.dot_dimension_numbers<[1], [0], [0], [1], [0, 0, 1, 1], [], []>} : vector<8x32xf32>, vector<32x128xf32>, vector<8x128xf32> -> vector<8x128xf32>
    %c0_12 = arith.constant 0 : index
    %c0_13 = arith.constant 0 : index
    %10 = vector.load %arg6[%c0_12, %c0_13] : memref<1x128xf32, #tpu.memory_space<vmem>>, vector<1x128xf32>
    %11 = vector.broadcast %10 : vector<1x128xf32> to vector<8x128xf32>
    %12 = arith.addf %9, %11 : vector<8x128xf32>
    %c0_14 = arith.constant 0 : index
    %c0_15 = arith.constant 0 : index
    %13 = vector.load %arg11[%c0_14, %c0_15] : memref<8x128xf32, #tpu.memory_space<vmem>>, vector<8x128xf32>
    tpu.vector_store %arg11[%c0_14, %c0_15], %12 {strides = array<i32>} : memref<8x128xf32, #tpu.memory_space<vmem>>, vector<8x128xf32>,
    %c0_16 = arith.constant 0 : index
    %c0_17 = arith.constant 0 : index
    %14 = vector.load %arg7[%c0_16, %c0_17] : memref<2x32xf32, #tpu.memory_space<vmem>>, vector<1x32xf32>
    %c1 = arith.constant 1 : index
    %c0_18 = arith.constant 0 : index
    %15 = vector.load %arg7[%c1, %c0_18] : memref<2x32xf32, #tpu.memory_space<vmem>>, vector<1x32xf32>
    %c0_i32 = arith.constant 0 : i32
    %c8_i32 = arith.constant 8 : i32
    %16 = arith.addi %c0_i32, %c8_i32 : i32
    %c1_i32 = arith.constant 1 : i32
    %17:4 = scf.for %arg12 = %c0_i32 to %16 step %c1_i32 iter_args(%arg13 = %14, %arg14 = %14, %arg15 = %15, %arg16 = %15) -> (vector<1x32xf32>, vector<1x32xf32>, vector<1x32xf32>, vector<1x32xf32>)  : i32 {
      %c7_i32 = arith.constant 7 : i32
      %18 = arith.subi %c7_i32, %arg12 : i32
      %19 = arith.index_cast %arg12 : i32 to index
      %c0_20 = arith.constant 0 : index
      %20 = vector.load %arg10[%19, %c0_20] : memref<8x128xf32, #tpu.memory_space<vmem>>, vector<1x128xf32>
      %c0_21 = arith.constant 0 : index
      %c0_22 = arith.constant 0 : index
      %21 = vector.load %arg2[%c0_21, %c0_22] : memref<32x128xf32, #tpu.memory_space<vmem>>, vector<32x128xf32>
      %cst_23 = arith.constant dense<0.000000e+00> : vector<1x128xf32>
      %22 = tpu.matmul %arg13, %21, %cst_23 {dimension_numbers = #tpu.dot_dimension_numbers<[1], [0], [0], [1], [0, 0, 1, 1], [], []>} : vector<1x32xf32>, vector<32x128xf32>, vector<1x128xf32> -> vector<1x128xf32>
      %23 = arith.addf %20, %22 : vector<1x128xf32>
      %24 = vector.extract_strided_slice %23 {offsets = [0, 0], sizes = [1, 32], strides = [1, 1]} : vector<1x128xf32> to vector<1x32xf32>
      %25 = arith.negf %24 : vector<1x32xf32>
      %26 = math.exp %25 : vector<1x32xf32>
      %cst_24 = arith.constant 1.000000e+00 : f32
      %27 = vector.broadcast %cst_24 : f32 to vector<1x32xf32>
      %28 = arith.addf %27, %26 : vector<1x32xf32>
      %29 = arith.divf %27, %28 : vector<1x32xf32>
      %30 = vector.extract_strided_slice %23 {offsets = [0, 32], sizes = [1, 32], strides = [1, 1]} : vector<1x128xf32> to vector<1x32xf32>
      %31 = arith.negf %30 : vector<1x32xf32>
      %32 = math.exp %31 : vector<1x32xf32>
      %cst_25 = arith.constant 1.000000e+00 : f32
      %33 = vector.broadcast %cst_25 : f32 to vector<1x32xf32>
      %34 = arith.addf %33, %32 : vector<1x32xf32>
      %35 = arith.divf %33, %34 : vector<1x32xf32>
      %36 = vector.extract_strided_slice %23 {offsets = [0, 64], sizes = [1, 32], strides = [1, 1]} : vector<1x128xf32> to vector<1x32xf32>
      %37 = math.tanh %36 : vector<1x32xf32>
      %38 = vector.extract_strided_slice %23 {offsets = [0, 96], sizes = [1, 32], strides = [1, 1]} : vector<1x128xf32> to vector<1x32xf32>
      %39 = arith.negf %38 : vector<1x32xf32>
      %40 = math.exp %39 : vector<1x32xf32>
      %cst_26 = arith.constant 1.000000e+00 : f32
      %41 = vector.broadcast %cst_26 : f32 to vector<1x32xf32>
      %42 = arith.addf %41, %40 : vector<1x32xf32>
      %43 = arith.divf %41, %42 : vector<1x32xf32>
      %44 = arith.mulf %35, %arg14 : vector<1x32xf32>
      %45 = arith.mulf %29, %37 : vector<1x32xf32>
      %46 = arith.addf %44, %45 : vector<1x32xf32>
      %47 = math.tanh %46 : vector<1x32xf32>
      %48 = arith.mulf %43, %47 : vector<1x32xf32>
      %49 = arith.index_cast %arg12 : i32 to index
      %c0_27 = arith.constant 0 : index
      %50 = vector.load %arg8[%49, %c0_27] : memref<8x32xf32, #tpu.memory_space<vmem>>, vector<1x32xf32>
      tpu.vector_store %arg8[%49, %c0_27], %48 {strides = array<i32>} : memref<8x32xf32, #tpu.memory_space<vmem>>, vector<1x32xf32>,
      %51 = arith.index_cast %18 : i32 to index
      %c0_28 = arith.constant 0 : index
      %52 = vector.load %arg11[%51, %c0_28] : memref<8x128xf32, #tpu.memory_space<vmem>>, vector<1x128xf32>
      %c0_29 = arith.constant 0 : index
      %c0_30 = arith.constant 0 : index
      %53 = vector.load %arg5[%c0_29, %c0_30] : memref<32x128xf32, #tpu.memory_space<vmem>>, vector<32x128xf32>
      %cst_31 = arith.constant dense<0.000000e+00> : vector<1x128xf32>
      %54 = tpu.matmul %arg15, %53, %cst_31 {dimension_numbers = #tpu.dot_dimension_numbers<[1], [0], [0], [1], [0, 0, 1, 1], [], []>} : vector<1x32xf32>, vector<32x128xf32>, vector<1x128xf32> -> vector<1x128xf32>
      %55 = arith.addf %52, %54 : vector<1x128xf32>
      %56 = vector.extract_strided_slice %55 {offsets = [0, 0], sizes = [1, 32], strides = [1, 1]} : vector<1x128xf32> to vector<1x32xf32>
      %57 = arith.negf %56 : vector<1x32xf32>
      %58 = math.exp %57 : vector<1x32xf32>
      %cst_32 = arith.constant 1.000000e+00 : f32
      %59 = vector.broadcast %cst_32 : f32 to vector<1x32xf32>
      %60 = arith.addf %59, %58 : vector<1x32xf32>
      %61 = arith.divf %59, %60 : vector<1x32xf32>
      %62 = vector.extract_strided_slice %55 {offsets = [0, 32], sizes = [1, 32], strides = [1, 1]} : vector<1x128xf32> to vector<1x32xf32>
      %63 = arith.negf %62 : vector<1x32xf32>
      %64 = math.exp %63 : vector<1x32xf32>
      %cst_33 = arith.constant 1.000000e+00 : f32
      %65 = vector.broadcast %cst_33 : f32 to vector<1x32xf32>
      %66 = arith.addf %65, %64 : vector<1x32xf32>
      %67 = arith.divf %65, %66 : vector<1x32xf32>
      %68 = vector.extract_strided_slice %55 {offsets = [0, 64], sizes = [1, 32], strides = [1, 1]} : vector<1x128xf32> to vector<1x32xf32>
      %69 = math.tanh %68 : vector<1x32xf32>
      %70 = vector.extract_strided_slice %55 {offsets = [0, 96], sizes = [1, 32], strides = [1, 1]} : vector<1x128xf32> to vector<1x32xf32>
      %71 = arith.negf %70 : vector<1x32xf32>
      %72 = math.exp %71 : vector<1x32xf32>
      %cst_34 = arith.constant 1.000000e+00 : f32
      %73 = vector.broadcast %cst_34 : f32 to vector<1x32xf32>
      %74 = arith.addf %73, %72 : vector<1x32xf32>
      %75 = arith.divf %73, %74 : vector<1x32xf32>
      %76 = arith.mulf %67, %arg16 : vector<1x32xf32>
      %77 = arith.mulf %61, %69 : vector<1x32xf32>
      %78 = arith.addf %76, %77 : vector<1x32xf32>
      %79 = math.tanh %78 : vector<1x32xf32>
      %80 = arith.mulf %75, %79 : vector<1x32xf32>
      %81 = arith.index_cast %18 : i32 to index
      %c0_35 = arith.constant 0 : index
      %82 = vector.load %arg9[%81, %c0_35] : memref<8x32xf32, #tpu.memory_space<vmem>>, vector<1x32xf32>
      tpu.vector_store %arg9[%81, %c0_35], %80 {strides = array<i32>} : memref<8x32xf32, #tpu.memory_space<vmem>>, vector<1x32xf32>,
      scf.yield %48, %46, %80, %78 : vector<1x32xf32>, vector<1x32xf32>, vector<1x32xf32>, vector<1x32xf32>
    }
    %c8_i32_19 = arith.constant 8 : i32
    return
  }
}

</mosaic_0001>

<bundles_post_ra>
// kernel: tpu_custom_call.1
= control target key start
LH: loop header
LB: loop body
LE: loop exit
PB: predicated region body
PF: predicated region fallthrough
CT: control target
= control target key end

     0   :  { %15 = vsyncpa [#allocation5], 0  ;;  %s1173_s0 = inlined_call_operand.hbm [shape: f32[8,32], index: 0, kind: input, shape index: {}]   ;;  %s1174_s1 = inlined_call_operand.hbm [shape: f32[32,128], index: 1, kind: input, shape index: {}]   ;;  %s1175_s2 = inlined_call_operand.hbm [shape: f32[32,128], index: 2, kind: input, shape index: {}]   ;;  %s1176_s3 = inlined_call_operand.vmem [shape: f32[1,128], index: 3, kind: input, shape index: {}]   ;;  %s1177_s4 = inlined_call_operand.hbm [shape: f32[32,128], index: 4, kind: input, shape index: {}]   ;;  %s1178_s5 = inlined_call_operand.hbm [shape: f32[32,128], index: 5, kind: input, shape index: {}]   ;;  %s1179_s6 = inlined_call_operand.vmem [shape: f32[1,128], index: 6, kind: input, shape index: {}]   ;;  %s1180_s7 = inlined_call_operand.vmem [shape: f32[2,32], index: 7, kind: input, shape index: {}]   ;;  %s1181_s8 = inlined_call_operand.hbm [shape: f32[8,32], index: 8, kind: output, shape index: {0}]   ;;  %s1182_s9 = inlined_call_operand.hbm [shape: f32[8,32], index: 9, kind: output, shape index: {1}]  }
   0x1   :  { %16 = vsyncpa [#allocation8], 0 }
   0x2   :  { %17 = vsyncpa [#allocation11], 0 }
   0x3   :  { %18 = vsyncpa [#allocation6], 0 }
   0x4   :  { %19 = vsyncpa [#allocation15], 0  ;;  %s948_s30 = smov [#allocation7]   ;;  %s744_s13 = scalar_lea.hbm %s1174_s1, 512 }
   0x5   :  { %s35_s10 = sshll.u32 %s948_s30, 4  ;;  %p745_p0 = scmp.ne.s32.totalorder %s1174_s1, %s744_s13  ;;  %s36_s10 = int_to_ptr.vmem [resolvable:$true] %s35_s10 }
   0x6   :  { %p748_p1 = scmp.lt.u32.totalorder %s744_s13, %s1174_s1 }
   0x8   :  { %p750_p2 = pnand %p748_p1, %p745_p0 }
   0xa   :  { %753 = shalt.err (!%p750_p2)
}
   0xb   :  { %s754_s18 = scalar_lea.vmem %s36_s10, 512  ;;  %p759_p4 = scmp.lt.s32.totalorder %s36_s10, %s36_s10 }
   0xc   :  { %p755_p3 = scmp.ne.s32.totalorder %s36_s10, %s754_s18  ;;  %p760_p5 = scmp.lt.s32.totalorder %s754_s18, %s754_s18 }
   0xe   :  { %p761_p6 = por %p760_p5, %p759_p4 }
  0x10   :  { %p762_p7 = pnand %p761_p6, %p755_p3 }
  0x12   :  { %765 = shalt.err (!%p762_p7)
}
  0x13   :  { %s949_s19 = smov 128   ;;  %s950_s20 = smov 8  }
  0x14   :  { %41 = dma.hbm_to_vmem [thread:$0]  %s1174_s1, 512, %s36_s10, [#allocation8], %s949_s19, %s949_s19, %s950_s20  }
  0x15   :  { %s951_s23 = smov [#allocation10]   ;;  %s952_s25 = smov [#allocation4]  }
  0x16   :  { %s61_s24 = sshll.u32 %s951_s23, 4  ;;  %s26_s26 = sshll.u32 %s952_s25, 4  ;;  %s62_s24 = int_to_ptr.vmem [resolvable:$true] %s61_s24  ;;  %s27_s26 = int_to_ptr.vmem [resolvable:$true] %s26_s26 }
  0x17   :  { %s766_s29 = scalar_lea.hbm %s1177_s4, 512 }
  0x18   :  { %p767_p8 = scmp.ne.s32.totalorder %s1177_s4, %s766_s29  ;;  %p770_p9 = scmp.lt.u32.totalorder %s766_s29, %s1177_s4 }
  0x1a   :  { %p772_p10 = pnand %p770_p9, %p767_p8 }
  0x1c   :  { %775 = shalt.err (!%p772_p10)
}
  0x1d   :  { %s776_s1 = scalar_lea.vmem %s62_s24, 512  ;;  %p781_p12 = scmp.lt.s32.totalorder %s62_s24, %s62_s24 }
  0x1e   :  { %p777_p11 = scmp.ne.s32.totalorder %s62_s24, %s776_s1  ;;  %p782_p13 = scmp.lt.s32.totalorder %s776_s1, %s776_s1 }
  0x20   :  { %p783_p0 = por %p782_p13, %p781_p12 }
  0x22   :  { %p784_p1 = pnand %p783_p0, %p777_p11 }
  0x24   :  { %787 = shalt.err (!%p784_p1)
}
  0x25   :  { %67 = dma.hbm_to_vmem [thread:$0]  %s1177_s4, 512, %s62_s24, [#allocation11], %s949_s19, %s949_s19, %s950_s20  }
  0x26   :  { %s788_s17 = scalar_lea.hbm %s1173_s0, 128 }
  0x27   :  { %p789_p2 = scmp.ne.s32.totalorder %s1173_s0, %s788_s17  ;;  %p792_p3 = scmp.lt.u32.totalorder %s788_s17, %s1173_s0 }
  0x29   :  { %p794_p4 = pnand %p792_p3, %p789_p2 }
  0x2b   :  { %797 = shalt.err (!%p794_p4)
}
  0x2c   :  { %s798_s25 = scalar_lea.vmem %s27_s26, 128  ;;  %p803_p6 = scmp.lt.s32.totalorder %s27_s26, %s27_s26 }
  0x2d   :  { %p799_p5 = scmp.ne.s32.totalorder %s27_s26, %s798_s25  ;;  %p804_p7 = scmp.lt.s32.totalorder %s798_s25, %s798_s25 }
  0x2f   :  { %p805_p8 = por %p804_p7, %p803_p6 }
  0x31   :  { %p806_p9 = pnand %p805_p8, %p799_p5 }
  0x33   :  { %809 = shalt.err (!%p806_p9)
}
  0x34   :  { %29 = dma.hbm_to_vmem [thread:$0]  %s1173_s0, 128, %s27_s26, [#allocation5]  }
  0x35   :  { %s953_s27 = smov [#allocation9]   ;;  %s954_s29 = smov [#allocation12]  }
  0x36   :  { %s47_s28 = sshll.u32 %s953_s27, 4  ;;  %s73_s30 = sshll.u32 %s954_s29, 4  ;;  %s48_s28 = int_to_ptr.vmem [resolvable:$true] %s47_s28  ;;  %s74_s30 = int_to_ptr.vmem [resolvable:$true] %s73_s30 }
  0x37   :  { %s810_s13 = scalar_lea.hbm %s1175_s2, 512 }
  0x38   :  { %p811_p10 = scmp.ne.s32.totalorder %s1175_s2, %s810_s13  ;;  %p814_p11 = scmp.lt.u32.totalorder %s810_s13, %s1175_s2 }
  0x3a   :  { %p816_p12 = pnand %p814_p11, %p811_p10 }
  0x3c   :  { %819 = shalt.err (!%p816_p12)
}
  0x3d   :  { %s820_s0 = scalar_lea.vmem %s48_s28, 512  ;;  %p825_p0 = scmp.lt.s32.totalorder %s48_s28, %s48_s28 }
  0x3e   :  { %p821_p13 = scmp.ne.s32.totalorder %s48_s28, %s820_s0  ;;  %p826_p1 = scmp.lt.s32.totalorder %s820_s0, %s820_s0 }
  0x40   :  { %p827_p2 = por %p826_p1, %p825_p0 }
  0x42   :  { %p828_p3 = pnand %p827_p2, %p821_p13 }
  0x44   :  { %831 = shalt.err (!%p828_p3)
}
  0x45   :  { %53 = dma.hbm_to_vmem [thread:$0]  %s1175_s2, 512, %s48_s28, [#allocation8], %s949_s19, %s949_s19, %s950_s20  }
  0x46   :  { %s832_s21 = scalar_lea.hbm %s1178_s5, 512 }
  0x47   :  { %p833_p4 = scmp.ne.s32.totalorder %s1178_s5, %s832_s21  ;;  %p836_p5 = scmp.lt.u32.totalorder %s832_s21, %s1178_s5 }
  0x49   :  { %p838_p6 = pnand %p836_p5, %p833_p4 }
  0x4b   :  { %841 = shalt.err (!%p838_p6)
}
  0x4c   :  { %s842_s24 = scalar_lea.vmem %s74_s30, 512  ;;  %p847_p8 = scmp.lt.s32.totalorder %s74_s30, %s74_s30 }
  0x4d   :  { %p843_p7 = scmp.ne.s32.totalorder %s74_s30, %s842_s24  ;;  %p848_p9 = scmp.lt.s32.totalorder %s842_s24, %s842_s24 }
  0x4f   :  { %p849_p10 = por %p848_p9, %p847_p8 }
  0x51   :  { %p850_p11 = pnand %p849_p10, %p843_p7 }
  0x53   :  { %853 = shalt.err (!%p850_p11)
}
  0x54   :  { %79 = dma.hbm_to_vmem [thread:$0]  %s1178_s5, 512, %s74_s30, [#allocation11], %s949_s19, %s949_s19, %s950_s20  }
  0x55   :  { %918 = dma.done.wait [#allocation5], 128  }
  0x56   :  { %919 = vsyncadd [#allocation5], 4294967168 }
  0x57   :  { %920 = dma.done.wait [#allocation8], 1024  }
  0x58   :  { %921 = vsyncadd [#allocation8], 4294966272 }
  0x59   :  { %922 = dma.done.wait [#allocation11], 1024  }
  0x5a   :  { %923 = vsyncadd [#allocation11], 4294966272  ;;  %v955_v0 = vmov 0.0|0.0   ;;  %vm956_vm0 = vmmov 0   ;;  %v957_v1 = vmov 0.0   ;;  %v100_v4 = vld [vmem:[#allocation7] sm:$0xff] }
  0x5b   :  { %646 = vmatprep.subr.bf16.mxu0 %v955_v0  ;;  %652 = vmatprep.subr.bf16.mxu1 %v955_v0  ;;  %v272_v2 = vld [vmem:[%s1180_s7] sm:$0x1]   ;;  %v273_v3 = vld [vmem:[%s1180_s7 + $0x1] sm:$0x1]   ;;  %v187_v6 = vld [vmem:[#allocation10] sm:$0xff]  ;;  %vm111_vm1 = vcmask 261120  }
  0x5c   :  { %610 = vmatprep.mubr.msk.f32.mxu0 %vm956_vm0, %v957_v1  ;;  %621 = vmatprep.mubr.msk.f32.mxu1 %vm956_vm0, %v957_v1  ;;  %v101_v5 = vld [vmem:[#allocation7 + $0x8] sm:$0xff]  ;;  %v102_v10 = vld [vmem:[#allocation7 + $0x10] sm:$0xff]  ;;  %v103_v11 = vld [vmem:[#allocation7 + $0x18] sm:$0xff]  ;;  %v1183_v25 = vmov %v273_v3  ;;  %v1184_v26 = vmov %v272_v2 }
  0x5d   :  { %v188_v7 = vld [vmem:[#allocation10 + $0x8] sm:$0xff]  ;;  %v647_v8 = vpack.c.bf16 %v101_v5, %v100_v4  ;;  %v189_v12 = vld [vmem:[#allocation10 + $0x10] sm:$0xff]  ;;  %v190_v13 = vld [vmem:[#allocation10 + $0x18] sm:$0xff]  ;;  %v650_v14 = vpack.c.bf16 %v103_v11, %v102_v10 }
  0x5e   :  { %v653_v9 = vpack.c.bf16 %v188_v7, %v187_v6  ;;  %v656_v15 = vpack.c.bf16 %v190_v13, %v189_v12  ;;  %v99_v16 = vld [vmem:[#allocation4] sm:$0xff]  ;;  %v574_v17 = vld [vmem:[%s1176_s3] ss:$0 sm:$0xff]  ;;  %s1110_s3 = smov 0  }
  0x5f   :  { %648 = vmatpush3.bf16.msra.mxu0 %v647_v8  ;;  %v576_v18 = vld [vmem:[%s1179_s6] ss:$0 sm:$0xff] }
  0x60   :  { %654 = vmatpush3.bf16.msra.mxu1 %v653_v9  ;;  %649 = vmatprep.subr.bf16.mxu0 %v955_v0 }
  0x61   :  { %655 = vmatprep.subr.bf16.mxu1 %v955_v0 }
  0x63   :  { %651 = vmatpush3.bf16.msra.mxu0 %v650_v14 }
  0x64   :  { %657 = vmatpush3.bf16.msra.mxu1 %v656_v15 }
  0x66   :  { %611 = vmatmul.mubr.msk.f32.vlgmr.msra.gmra.mrb[0].mxu0 %vm111_vm1, %v99_v16 }
  0x67   :  { %622 = vmatmul.mubr.msk.f32.vlgmr.msra.gmra.mrb[0].mxu1 %vm111_vm1, %v99_v16 }
 0x139   :  { %v181_v19 = vpop.f32.mrb[0].mxu0 }
 0x13a   :  { %v267_v20 = vpop.f32.mrb[0].mxu1  ;;  %v182_v21 = vadd.f32 %v574_v17, %v181_v19  ;;  %v612_v23 = vpop.f32.mrb[1].mxu0 }
 0x13b   :  { %v268_v22 = vadd.f32 %v576_v18, %v267_v20  ;;  %v623_v24 = vpop.f32.mrb[1].mxu1 }
 0x13c   :  { %185 = vst [vmem:[#allocation2] sm:$0xff] %v182_v21 }
 0x13d   :  { %271 = vst [vmem:[#allocation3] sm:$0xff] %v268_v22 }
 0x13e LB: > { %v287_v27 = vld [vmem:[#allocation9] sm:$0xff]  ;;  %v288_v28 = vld [vmem:[#allocation9 + $0x8] sm:$0xff]  ;;  %v958_v30 = vmov 0.0|0.0   ;;  %v289_v33 = vld [vmem:[#allocation9 + $0x10] sm:$0xff]  ;;  %vm959_vm2 = vmmov 0   ;;  %v960_v36 = vmov 0.0   ;;  %s946_s3 = sphi %s1110_s3, %s279_s3   ;;  %v942_v2 = vphi %v272_v2, %v395_v2   ;;  %v938_v26 = vphi %v1184_v26, %v516_v26   ;;  %v934_v3 = vphi %v273_v3, %v510_v3   ;;  %v930_v25 = vphi %v1183_v25, %v520_v25  }
 0x13f   : > { %v402_v29 = vld [vmem:[#allocation12] sm:$0xff]  ;;  %658 = vmatprep.subr.bf16.mxu0 %v958_v30  ;;  %v659_v31 = vpack.c.bf16 %v288_v28, %v287_v27  ;;  %664 = vmatprep.subr.bf16.mxu1 %v958_v30  ;;  %v403_v32 = vld [vmem:[#allocation12 + $0x8] sm:$0xff]  ;;  %v290_v34 = vld [vmem:[#allocation9 + $0x18] sm:$0xff]  ;;  %s961_s6 = smov 32   ;;  %s284_s30 = ssub.s32 7, %s946_s3  ;;  %vm398_vm3 = vcmask 253952  }
 0x140   : > { %v665_v35 = vpack.c.bf16 %v403_v32, %v402_v29  ;;  %632 = vmatprep.mubr.msk.f32.mxu0 %vm959_vm2, %v960_v36  ;;  %v404_v37 = vld [vmem:[#allocation12 + $0x10] sm:$0xff]  ;;  %v405_v38 = vld [vmem:[#allocation12 + $0x18] sm:$0xff]  ;;  %643 = vmatprep.mubr.msk.f32.mxu1 %vm959_vm2, %v960_v36  ;;  %v662_v39 = vpack.c.bf16 %v290_v34, %v289_v33  ;;  %s285_s13 = scalar_lea.vmem [#allocation2], %s946_s3  ;;  %s400_s1 = scalar_lea.vmem [#allocation3], %s284_s30 }
 0x141   : > { %660 = vmatpush3.bf16.msra.mxu0 %v659_v31  ;;  %373 = vrot.lane.b32.xlu1 %v938_v26, %s961_s6  ;;  %v668_v40 = vpack.c.bf16 %v405_v38, %v404_v37  ;;  %s962_s10 = smov 64   ;;  %s963_s14 = smov 96  }
 0x142   : > { %661 = vmatprep.subr.bf16.mxu0 %v958_v30  ;;  %666 = vmatpush3.bf16.msra.mxu1 %v665_v35  ;;  %s397_s15 = scalar_lea.vmem [#allocation13], %s946_s3  ;;  %s512_s0 = scalar_lea.vmem [#allocation14], %s284_s30 }
 0x143   : > { %667 = vmatprep.subr.bf16.mxu1 %v958_v30  ;;  %v286_v41 = vld [vmem:[%s285_s13] sm:$0x1]  ;;  %s279_s3 = sadd.s32 1, %s946_s3  }
 0x144   : > { %v401_v42 = vld [vmem:[%s400_s1] sm:$0x1]  ;;  %p276_p12 = scmp.ge.s32.totalorder %s279_s3, 8  }
 0x145   : > { %663 = vmatpush3.bf16.msra.mxu0 %v662_v39  ;;  %488 = vrot.lane.b32.xlu1 %v930_v25, %s961_s6  ;;  %s964_s26 = smov (%p276_p12), [#allocation13]   ;;  %s965_s17 = smov (%p276_p12), [#allocation14]  }
 0x146   : > { %669 = vmatpush3.bf16.msra.mxu1 %v668_v40  ;;  %s528_s16 = sshll.u32 (%p276_p12), %s964_s26, 4  ;;  %s538_s18 = sshll.u32 (%p276_p12), %s965_s17, 4  ;;  %s529_s16 = int_to_ptr.vmem [resolvable:$true] %s528_s16  ;;  %s539_s18 = int_to_ptr.vmem [resolvable:$true] %s538_s18 }
 0x147   :  { %s854_s21 = scalar_lea.vmem (%p276_p12), %s529_s16, 128  ;;  %p859_p0 = scmp.lt.s32.totalorder (%p276_p12), %s529_s16, %s529_s16 }
 0x148   : > { %633 = vmatmul.mubr.msk.f32.vlgmr.msra.gmra.mrb[0].mxu0 %vm111_vm1, %v942_v2  ;;  %p855_p13 = scmp.ne.s32.totalorder (%p276_p12), %s529_s16, %s854_s21  ;;  %p860_p1 = scmp.lt.s32.totalorder (%p276_p12), %s854_s21, %s854_s21 }
 0x149   : > { %644 = vmatmul.mubr.msk.f32.vlgmr.msra.gmra.mrb[0].mxu1 %vm111_vm1, %v934_v3 }
 0x14a   :  { %p861_p2 = por (%p276_p12), %p860_p1, %p859_p0 }
 0x14c   :  { %p862_p3 = pnand (%p276_p12), %p861_p2, %p855_p13 }
 0x1b3   : > { %v374_v63 = vpop.permute.xlu1 %373 }
 0x1b7   : > { %v489_v1 = vpop.permute.xlu1 %488 }
 0x21b   : > { %v360_v43 = vpop.f32.mrb[0].mxu0 }
 0x21c   : > { %v364_v44 = vadd.f32 %v360_v43, %v286_v41  ;;  %v634_v45 = vpop.f32.mrb[1].mxu0  ;;  %v475_v46 = vpop.f32.mrb[0].mxu1 }
 0x21d   : > { %v479_v47 = vadd.f32 %v475_v46, %v401_v42  ;;  %v645_v48 = vpop.f32.mrb[1].mxu1 }
 0x21e   : > { %728 = vtanh.f32 %v364_v44  ;;  %v579_v51 = vmul.f32 -1.442695, %v364_v44 }
 0x21f   : > { %730 = vtanh.f32 %v479_v47  ;;  %v581_v52 = vmul.f32 -1.442695, %v479_v47 }
 0x220   : > { %732 = vpow2.f32 %v579_v51 }
 0x221   : > { %734 = vpow2.f32 %v581_v52 }
 0x228   : > { %v729_v49 = vpop.eup %728 }
 0x229   : > { %378 = vrot.lane.b32.xlu0 %v729_v49, %s962_s10  ;;  %v731_v50 = vpop.eup %730 }
 0x22a   : > { %v733_v53 = vpop.eup %732 }
 0x22b   : > { %v368_v54 = vadd.f32 1.0, %v733_v53  ;;  %v735_v55 = vpop.eup %734 }
 0x22c   : > { %v483_v56 = vadd.f32 1.0, %v735_v55 }
 0x22d   : > { %493 = vrot.lane.b32.xlu0 %v731_v50, %s962_s10  ;;  %736 = vrcp.f32 %v368_v54 }
 0x22e   : > { %738 = vrcp.f32 %v483_v56 }
 0x237   : > { %v737_v57 = vpop.eup %736 }
 0x238   : > { %v739_v60 = vpop.eup %738  ;;  %v376_v0 = vmul.f32 %v737_v57, %v374_v63 }
 0x239   : > { %v491_v4 = vmul.f32 %v739_v60, %v489_v1 }
 0x29b   : > { %v379_v58 = vpop.permute.xlu0 %378 }
 0x29c   : > { %v381_v59 = vmul.f32 %v737_v57, %v379_v58 }
 0x29e   : > { %383 = vrot.lane.b32.xlu0 %v381_v59, %s961_s6 }
 0x29f   : > { %v494_v61 = vpop.permute.xlu0 %493 }
 0x2a0   : > { %v496_v62 = vmul.f32 %v739_v60, %v494_v61 }
 0x2a2   : > { %498 = vrot.lane.b32.xlu1 %v496_v62, %s961_s6 }
 0x310   : > { %v384_v2 = vpop.permute.xlu0 %383 }
 0x311   : > { %v386_v3 = vadd.f32 %v384_v2, %v376_v0 }
 0x313   : > { %740 = vtanh.f32 %v386_v3 }
 0x314   : > { %v499_v5 = vpop.permute.xlu1 %498 }
 0x315   : > { %v501_v6 = vadd.f32 %v499_v5, %v491_v4 }
 0x317   : > { %742 = vtanh.f32 %v501_v6 }
 0x31d   : > { %v741_v7 = vpop.eup %740 }
 0x31e   : > { %389 = vrot.lane.b32.xlu0 %v741_v7, %s962_s10 }
 0x321   : > { %v743_v8 = vpop.eup %742 }
 0x322   : > { %504 = vrot.lane.b32.xlu1 %v743_v8, %s962_s10 }
 0x390   : > { %v390_v9 = vpop.permute.xlu0 %389 }
 0x391   : > { %v392_v10 = vmul.f32 %v737_v57, %v390_v9 }
 0x393   : > { %394 = vrot.lane.b32.xlu0 %v392_v10, %s961_s6 }
 0x394   : > { %v505_v11 = vpop.permute.xlu1 %504 }
 0x395   : > { %v507_v12 = vmul.f32 %v739_v60, %v505_v11 }
 0x397   : > { %515 = vrot.lane.b32.xlu0 %v386_v3, %s963_s14  ;;  %509 = vrot.lane.b32.xlu1 %v507_v12, %s961_s6 }
 0x39b   : > { %519 = vrot.lane.b32.xlu1 %v501_v6, %s963_s14 }
 0x405   : > { %v395_v2 = vpop.permute.xlu0 %394  }
 0x406   : > { %399 = vst.msk [vmem:[%s397_s15] sm:$0x1] %vm398_vm3, %v395_v2 }
 0x407   :  { %278 = sbr.rel (!%p276_p12) target bundleno = 318 (0x13e), region = 91 }
 0x409   : > { %v516_v26 = vpop.permute.xlu0 %515   ;;  %v510_v3 = vpop.permute.xlu1 %509  }
 0x40a   : > { %513 = vst.msk [vmem:[%s512_s0] sm:$0x1] %vm398_vm3, %v510_v3 }
 0x40d   : > { %v520_v25 = vpop.permute.xlu1 %519  }
 0x40e   :  { %865 = shalt.err (!%p862_p3)
}
 0x40f   :  { %s866_s25 = scalar_lea.hbm %s1181_s8, 128 }
 0x410   :  { %p867_p4 = scmp.ne.s32.totalorder %s1181_s8, %s866_s25  ;;  %p870_p5 = scmp.lt.u32.totalorder %s866_s25, %s1181_s8 }
 0x412   :  { %p872_p6 = pnand %p870_p5, %p867_p4 }
 0x414   :  { %875 = shalt.err (!%p872_p6)
}
 0x415   :  { %531 = dma.vmem_to_hbm [thread:$0]  %s529_s16, 128, %s1181_s8, [#allocation6]  }
 0x416   :  { %s876_s11 = scalar_lea.vmem %s539_s18, 128  ;;  %p881_p8 = scmp.lt.s32.totalorder %s539_s18, %s539_s18 }
 0x417   :  { %p877_p7 = scmp.ne.s32.totalorder %s539_s18, %s876_s11  ;;  %p882_p9 = scmp.lt.s32.totalorder %s876_s11, %s876_s11 }
 0x419   :  { %p883_p10 = por %p882_p9, %p881_p8 }
 0x41b   :  { %p884_p11 = pnand %p883_p10, %p877_p7 }
 0x41d   :  { %887 = shalt.err (!%p884_p11)
}
 0x41e   :  { %s888_s7 = scalar_lea.hbm %s1182_s9, 128 }
 0x41f   :  { %p889_p12 = scmp.ne.s32.totalorder %s1182_s9, %s888_s7  ;;  %p892_p13 = scmp.lt.u32.totalorder %s888_s7, %s1182_s9 }
 0x421   :  { %p894_p0 = pnand %p892_p13, %p889_p12 }
 0x423   :  { %897 = shalt.err (!%p894_p0)
}
 0x424   :  { %541 = dma.vmem_to_hbm [thread:$0]  %s539_s18, 128, %s1182_s9, [#allocation15]  }
 0x425   :  { %924 = dma.done.wait [#allocation6], 128  }
 0x426   :  { %925 = vsyncadd [#allocation6], 4294967168 }
 0x427   :  { %926 = dma.done.wait [#allocation15], 128  }
 0x428   :  { %927 = vsyncadd [#allocation15], 4294967168 }
 0x429   :  { %548 = vsyncpa [#allocation5], 1 }
 0x42a   :  { %549 = vsyncpa [#allocation8], 1 }
 0x42b   :  { %550 = vsyncpa [#allocation11], 1 }
 0x42c   :  { %551 = vsyncpa [#allocation6], 1 }
 0x42d   :  { %552 = vsyncpa [#allocation15], 1 }

</bundles_post_ra>
